<compile_context>
chip_gen: v5e
topology: v5e:2x2
jax: 0.10.0
libtpu: 0.0.40
codegen_flags: <defaults>
</compile_context>

<pallas_src>
import functools
import math

import jax
import jax.numpy as jnp
import numpy as np
from jax import lax
from jax.experimental import pallas as pl
from jax.experimental.pallas import tpu as pltpu


def _round_up(x, m):
    return ((x + m - 1) // m) * m


def _normalize_params(kernel_size, sigma):
    if isinstance(kernel_size, (int, float)):
        kernel_size = [int(kernel_size)] * 2
    if isinstance(sigma, (int, float)):
        sigma = [float(sigma)] * 2
    return [int(k) for k in kernel_size], [float(s) for s in sigma]


def _gaussian_1d(size, std):
    """Unnormalized 1-D Gaussian taps, float32 throughout (torch recipe per axis)."""
    x = np.arange(size, dtype=np.float32)
    mean = np.float32((size - 1) / 2.0)
    g = (np.float32(1.0 / (std * math.sqrt(2.0 * math.pi)))
         * np.exp(-(((x - mean) / np.float32(std)) ** 2) / np.float32(2.0)))
    return g.astype(np.float32)


def _gaussian_kernels_separable(kernel_size, sigma):
    """Two normalized 1-D kernels whose outer product equals the normalized 2-D
    Gaussian buffer built by the PyTorch module (exact up to f32 rounding)."""
    ks, sg = _normalize_params(kernel_size, sigma)
    out = []
    for size, std in zip(ks, sg):
        g = _gaussian_1d(size, std)
        out.append((g / g.sum(dtype=np.float32)).astype(np.float32))
    return out  # [kv (KH,), kh (KW,)]


def _gaussian_kernel_2d(kernel_size, sigma):
    """The exact 2-D buffer from the PyTorch recipe (f32) — reference only."""
    ks, sg = _normalize_params(kernel_size, sigma)
    gy = _gaussian_1d(ks[0], sg[0])
    gx = _gaussian_1d(ks[1], sg[1])
    k = np.outer(gy, gx).astype(np.float32)
    return (k / k.sum(dtype=np.float32)).astype(np.float32)


def _gauss_dw2d_kernel(x_ref, o_ref, xp_ref, *, H, W, KH, KW, PH, PW,
                       H_out, W_out, RT, CL, wv, wh):
    """Separable depthwise Gaussian conv for one (batch, channel-tile) block.

    x_ref : (1, TC, H, W)            input block (NCHW)
    o_ref : (1, TC, H_out, W_out)    output block (NCHW)
    xp_ref: (TC, RT+H+PH, CL+W+PW)   VMEM scratch; interior stored at the
                                     (sublane, lane)-aligned offset (RT, CL)
    wv/wh : KH-/KW-tuples of Python floats (compile-time constants)
    """
    TC = x_ref.shape[1]
    r0 = RT - PH                      # logical padded window origin (rows)
    c0 = CL - PW                      # logical padded window origin (cols)
    Wp = W + 2 * PW                   # logical padded width

    # Halo-only zeroing: only the strips the taps actually read.
    if PH > 0:
        zrow = jnp.zeros((TC, PH, Wp), jnp.float32)
        xp_ref[:, r0:RT, c0:c0 + Wp] = zrow
        xp_ref[:, RT + H:RT + H + PH, c0:c0 + Wp] = zrow
    if PW > 0:
        zcol = jnp.zeros((TC, H, PW), jnp.float32)
        xp_ref[:, RT:RT + H, c0:CL] = zcol
        xp_ref[:, RT:RT + H, CL + W:CL + W + PW] = zcol

    # Aligned interior store (RT % 8 == 0, CL % 128 == 0 -> unrotated vst).
    xp_ref[:, RT:RT + H, CL:CL + W] = x_ref[0].astype(jnp.float32)

    # --- vertical 1-D pass (sublane shifts), symmetry-folded ---------------
    def vtap(dy):
        return xp_ref[:, r0 + dy:r0 + dy + H_out, c0:c0 + Wp]

    if KH == 1:
        mid = wv[0] * vtap(0)
    else:
        mid = wv[0] * (vtap(0) + vtap(KH - 1))
        for dy in range(1, KH // 2):
            mid = mid + wv[dy] * (vtap(dy) + vtap(KH - 1 - dy))
        if KH % 2 == 1:
            mid = mid + wv[KH // 2] * vtap(KH // 2)

    # --- horizontal 1-D pass (lane shifts), symmetry-folded ----------------
    def htap(dx):
        return mid[:, :, dx:dx + W_out]

    if KW == 1:
        acc = wh[0] * htap(0)
    else:
        acc = wh[0] * (htap(0) + htap(KW - 1))
        for dx in range(1, KW // 2):
            acc = acc + wh[dx] * (htap(dx) + htap(KW - 1 - dx))
        if KW % 2 == 1:
            acc = acc + wh[KW // 2] * htap(KW // 2)

    o_ref[0] = acc.astype(o_ref.dtype)


_VMEM_BUDGET_BYTES = 12 * 1024 * 1024   # target per-step working set
_VMEM_LIMIT_BYTES = 48 * 1024 * 1024    # scoped limit (safe vs v7x's 64 MiB VMEM)


def _pick_channel_tile(C, H, W, H_out, W_out, rows, cols, PW):
    """Largest divisor of C whose per-step VMEM footprint fits the budget."""
    def tiled_bytes(h, w):  # (8,128)-tile-padded f32 footprint
        return _round_up(max(h, 1), 8) * _round_up(max(w, 1), 128) * 4

    per_c = (2 * tiled_bytes(H, W)                 # double-buffered input block
             + 2 * tiled_bytes(H_out, W_out)       # double-buffered output block
             + tiled_bytes(rows, cols)             # padded scratch
             + tiled_bytes(H_out, W + 2 * PW))     # separable intermediate
    cap = max(1, _VMEM_BUDGET_BYTES // per_c)
    for tc in range(min(C, cap), 0, -1):
        if C % tc == 0:
            return tc
    return 1


def gaussian_smoothing(inp, *, kernel_size, sigma, padding):
    """GaussianSmoothing(channels=C, kernel_size, sigma, padding, dim=2)(inp).

    inp: (N, C, H, W) NCHW (f32 or bf16; compute is f32).
    Returns (N, C, H_out, W_out) in inp.dtype.
    """
    assert inp.ndim == 4, "only the dim=2 (NCHW) path is implemented"
    N, C, H, W = inp.shape
    kv, kh = _gaussian_kernels_separable(kernel_size, sigma)
    KH, KW = int(kv.shape[0]), int(kh.shape[0])
    if isinstance(padding, (tuple, list)):
        PH, PW = int(padding[0]), int(padding[1])
    else:
        PH = PW = int(padding)
    H_out = H + 2 * PH - KH + 1
    W_out = W + 2 * PW - KW + 1
    assert H_out > 0 and W_out > 0, "invalid kernel_size/padding combination"

    # (8,128)-aligned interior placement inside the padded scratch.
    RT = _round_up(PH, 8) if PH > 0 else 0
    CL = _round_up(PW, 128) if PW > 0 else 0
    rows = RT + H + PH
    cols = CL + W + PW

    TC = _pick_channel_tile(C, H, W, H_out, W_out, rows, cols, PW)

    kernel = functools.partial(
        _gauss_dw2d_kernel, H=H, W=W, KH=KH, KW=KW, PH=PH, PW=PW,
        H_out=H_out, W_out=W_out, RT=RT, CL=CL,
        wv=tuple(float(v) for v in kv), wh=tuple(float(v) for v in kh))

    return pl.pallas_call(
        kernel,
        out_shape=jax.ShapeDtypeStruct((N, C, H_out, W_out), inp.dtype),
        grid=(N, C // TC),
        in_specs=[pl.BlockSpec((1, TC, H, W), lambda n, c: (n, c, 0, 0))],
        out_specs=pl.BlockSpec((1, TC, H_out, W_out), lambda n, c: (n, c, 0, 0)),
        scratch_shapes=[pltpu.VMEM((TC, rows, cols), jnp.float32)],
        compiler_params=pltpu.CompilerParams(
            dimension_semantics=("parallel", "parallel"),
            vmem_limit_bytes=_VMEM_LIMIT_BYTES),
    )(inp)


# ----------------------- pure-JAX reference (for checking) -----------------------
def gaussian_smoothing_reference(inp, *, kernel_size, sigma, padding):
    C = inp.shape[1]
    k2d = jnp.asarray(_gaussian_kernel_2d(kernel_size, sigma))
    w = jnp.tile(k2d[None, None], (C, 1, 1, 1))          # (C, 1, KH, KW), OIHW
    if isinstance(padding, (tuple, list)):
        PH, PW = int(padding[0]), int(padding[1])
    else:
        PH = PW = int(padding)
    return lax.conv_general_dilated(
        inp, w, window_strides=(1, 1),
        padding=[(PH, PH), (PW, PW)],
        dimension_numbers=("NCHW", "OIHW", "NCHW"),
        feature_group_count=C)


if __name__ == "__main__":
    N, C, H, W = 2, 4, 16, 16
    key = jax.random.PRNGKey(0)
    inp = jax.random.normal(key, (N, C, H, W), jnp.float32)

    configs = [
        dict(kernel_size=3, sigma=1.0, padding=1),   # 'same' conv (rbqe-style)
        dict(kernel_size=5, sigma=1.5, padding=2),   # larger kernel, 'same'
        dict(kernel_size=3, sigma=0.8, padding=2),   # output larger than input
    ]
    for cfg in configs:
        out = jax.block_until_ready(gaussian_smoothing(inp, **cfg))
        ref = jax.block_until_ready(gaussian_smoothing_reference(inp, **cfg))
        K = int(cfg["kernel_size"])
        P = int(cfg["padding"])
        assert out.shape == (N, C, H + 2 * P - K + 1, W + 2 * P - K + 1), out.shape
        np.testing.assert_allclose(np.asarray(out), np.asarray(ref),
                                   rtol=1e-5, atol=1e-5)
    print("KERNEL_OK")
</pallas_src>

<mosaic_0001>
module attributes {stable_mosaic.version = 11 : i64} {
  func.func @_gauss_dw2d_kernel(%arg0: i32, %arg1: i32, %arg2: memref<1x4x16x16xf32, #tpu.memory_space<vmem>>, %arg3: memref<1x4x16x16xf32, #tpu.memory_space<vmem>>, %arg4: memref<4x25x145xf32, #tpu.memory_space<vmem>>) attributes {dimension_semantics = [#tpu.dimension_semantics<parallel>, #tpu.dimension_semantics<parallel>], iteration_bounds = array<i64: 2, 1>, scalar_prefetch = 0 : i64, scratch_operands = 1 : i64, tpu.core_type = #tpu.core_type<tc>, window_params = [{transform_indices = @transform_0, window_bounds = array<i64: 1, 4, 16, 16>}, {transform_indices = @transform_1, window_bounds = array<i64: 1, 4, 16, 16>}]} {
    %cst = arith.constant 0.000000e+00 : f32
    %0 = vector.broadcast %cst : f32 to vector<4x1x18xf32>
    %c0 = arith.constant 0 : index
    %c7 = arith.constant 7 : index
    %c127 = arith.constant 127 : index
    %1 = vector.load %arg4[%c0, %c7, %c127] : memref<4x25x145xf32, #tpu.memory_space<vmem>>, vector<4x1x18xf32>
    tpu.vector_store %arg4[%c0, %c7, %c127], %0 {strides = array<i32>} : memref<4x25x145xf32, #tpu.memory_space<vmem>>, vector<4x1x18xf32>,
    %c0_0 = arith.constant 0 : index
    %c24 = arith.constant 24 : index
    %c127_1 = arith.constant 127 : index
    %2 = vector.load %arg4[%c0_0, %c24, %c127_1] : memref<4x25x145xf32, #tpu.memory_space<vmem>>, vector<4x1x18xf32>
    tpu.vector_store %arg4[%c0_0, %c24, %c127_1], %0 {strides = array<i32>} : memref<4x25x145xf32, #tpu.memory_space<vmem>>, vector<4x1x18xf32>,
    %cst_2 = arith.constant 0.000000e+00 : f32
    %3 = vector.broadcast %cst_2 : f32 to vector<4x16x1xf32>
    %c0_3 = arith.constant 0 : index
    %c8 = arith.constant 8 : index
    %c127_4 = arith.constant 127 : index
    %4 = vector.load %arg4[%c0_3, %c8, %c127_4] : memref<4x25x145xf32, #tpu.memory_space<vmem>>, vector<4x16x1xf32>
    tpu.vector_store %arg4[%c0_3, %c8, %c127_4], %3 {strides = array<i32>} : memref<4x25x145xf32, #tpu.memory_space<vmem>>, vector<4x16x1xf32>,
    %c0_5 = arith.constant 0 : index
    %c8_6 = arith.constant 8 : index
    %c144 = arith.constant 144 : index
    %5 = vector.load %arg4[%c0_5, %c8_6, %c144] : memref<4x25x145xf32, #tpu.memory_space<vmem>>, vector<4x16x1xf32>
    tpu.vector_store %arg4[%c0_5, %c8_6, %c144], %3 {strides = array<i32>} : memref<4x25x145xf32, #tpu.memory_space<vmem>>, vector<4x16x1xf32>,
    %c0_7 = arith.constant 0 : index
    %c0_8 = arith.constant 0 : index
    %c0_9 = arith.constant 0 : index
    %c0_10 = arith.constant 0 : index
    %6 = vector.load %arg2[%c0_7, %c0_8, %c0_9, %c0_10] : memref<1x4x16x16xf32, #tpu.memory_space<vmem>>, vector<1x4x16x16xf32>
    %7 = vector.shape_cast %6 : vector<1x4x16x16xf32> to vector<4x16x16xf32>
    %c0_11 = arith.constant 0 : index
    %c8_12 = arith.constant 8 : index
    %c128 = arith.constant 128 : index
    %8 = vector.load %arg4[%c0_11, %c8_12, %c128] : memref<4x25x145xf32, #tpu.memory_space<vmem>>, vector<4x16x16xf32>
    tpu.vector_store %arg4[%c0_11, %c8_12, %c128], %7 {strides = array<i32>} : memref<4x25x145xf32, #tpu.memory_space<vmem>>, vector<4x16x16xf32>,
    %c0_13 = arith.constant 0 : index
    %c7_14 = arith.constant 7 : index
    %c127_15 = arith.constant 127 : index
    %9 = vector.load %arg4[%c0_13, %c7_14, %c127_15] : memref<4x25x145xf32, #tpu.memory_space<vmem>>, vector<4x16x18xf32>
    %c0_16 = arith.constant 0 : index
    %c9 = arith.constant 9 : index
    %c127_17 = arith.constant 127 : index
    %10 = vector.load %arg4[%c0_16, %c9, %c127_17] : memref<4x25x145xf32, #tpu.memory_space<vmem>>, vector<4x16x18xf32>
    %11 = arith.addf %9, %10 : vector<4x16x18xf32>
    %cst_18 = arith.constant 0.274068624 : f32
    %12 = vector.broadcast %cst_18 : f32 to vector<4x16x18xf32>
    %13 = arith.mulf %12, %11 : vector<4x16x18xf32>
    %c0_19 = arith.constant 0 : index
    %c8_20 = arith.constant 8 : index
    %c127_21 = arith.constant 127 : index
    %14 = vector.load %arg4[%c0_19, %c8_20, %c127_21] : memref<4x25x145xf32, #tpu.memory_space<vmem>>, vector<4x16x18xf32>
    %cst_22 = arith.constant 0.451862782 : f32
    %15 = vector.broadcast %cst_22 : f32 to vector<4x16x18xf32>
    %16 = arith.mulf %15, %14 : vector<4x16x18xf32>
    %17 = arith.addf %13, %16 : vector<4x16x18xf32>
    %18 = vector.extract_strided_slice %17 {offsets = [0, 0, 0], sizes = [4, 16, 16], strides = [1, 1, 1]} : vector<4x16x18xf32> to vector<4x16x16xf32>
    %19 = vector.extract_strided_slice %17 {offsets = [0, 0, 2], sizes = [4, 16, 16], strides = [1, 1, 1]} : vector<4x16x18xf32> to vector<4x16x16xf32>
    %20 = arith.addf %18, %19 : vector<4x16x16xf32>
    %cst_23 = arith.constant 0.274068624 : f32
    %21 = vector.broadcast %cst_23 : f32 to vector<4x16x16xf32>
    %22 = arith.mulf %21, %20 : vector<4x16x16xf32>
    %23 = vector.extract_strided_slice %17 {offsets = [0, 0, 1], sizes = [4, 16, 16], strides = [1, 1, 1]} : vector<4x16x18xf32> to vector<4x16x16xf32>
    %cst_24 = arith.constant 0.451862782 : f32
    %24 = vector.broadcast %cst_24 : f32 to vector<4x16x16xf32>
    %25 = arith.mulf %24, %23 : vector<4x16x16xf32>
    %26 = arith.addf %22, %25 : vector<4x16x16xf32>
    %c0_25 = arith.constant 0 : index
    %c0_26 = arith.constant 0 : index
    %c0_27 = arith.constant 0 : index
    %c0_28 = arith.constant 0 : index
    %27 = vector.load %arg3[%c0_25, %c0_26, %c0_27, %c0_28] : memref<1x4x16x16xf32, #tpu.memory_space<vmem>>, vector<1x4x16x16xf32>
    %28 = vector.shape_cast %27 : vector<1x4x16x16xf32> to vector<4x16x16xf32>
    %29 = vector.shape_cast %26 : vector<4x16x16xf32> to vector<1x4x16x16xf32>
    tpu.vector_store %arg3[%c0_25, %c0_26, %c0_27, %c0_28], %29 {strides = array<i32>} : memref<1x4x16x16xf32, #tpu.memory_space<vmem>>, vector<1x4x16x16xf32>,
    return
  }
  func.func @transform_0(%arg0: i32, %arg1: i32) -> (i32, i32, i32, i32) {
    %c0_i32 = arith.constant 0 : i32
    %c0_i32_0 = arith.constant 0 : i32
    %c0_i32_1 = arith.constant 0 : i32
    return %arg0, %arg1, %c0_i32, %c0_i32_0 : i32, i32, i32, i32
  }
  func.func @transform_1(%arg0: i32, %arg1: i32) -> (i32, i32, i32, i32) {
    %c0_i32 = arith.constant 0 : i32
    %c0_i32_0 = arith.constant 0 : i32
    %c0_i32_1 = arith.constant 0 : i32
    return %arg0, %arg1, %c0_i32, %c0_i32_0 : i32, i32, i32, i32
  }
}

</mosaic_0001>

<bundles_post_ra>
// kernel: tpu_custom_call.1
= control target key start
LH: loop header
LB: loop body
LE: loop exit
PB: predicated region body
PF: predicated region fallthrough
CT: control target
= control target key end

     0   :  { %6 = vsyncpa [#allocation4], 0  ;;  %s1674_s0 = inlined_call_operand.hbm [shape: f32[2,4,16,16], index: 0, kind: input, shape index: {}]   ;;  %s1675_s1 = inlined_call_operand.hbm [shape: f32[2,4,16,16], index: 1, kind: output, shape index: {}]  }
   0x1   :  { %8 = vsyncpa [#allocation4 + $0x1], 0 }
   0x2   :  { %9 = vsyncpa [#allocation5], 0 }
   0x3   :  { %11 = vsyncpa [#allocation5 + $0x1], 0  ;;  %s1117_s6 = smov 0   ;;  %s1119_s7 = smov 0  }
   0x4   :  { %s1121_s8 = smov 0   ;;  %s1123_s9 = smov 0  }
   0x5   :  { %s1125_s10 = smov 0   ;;  %s1127_s11 = smov 0  }
   0x6 LB: > { %s898_s12 = sadd.s32 4294967295, %s1097_s11   ;;  %s899_s13 = sadd.s32 4294967294, %s1097_s11   ;;  %s1097_s11 = sphi %s1127_s11, %s17_s11   ;;  %s1093_s10 = sphi %s1125_s10, %s1684_s10   ;;  %s1089_s9 = sphi %s1123_s9, %s1683_s9   ;;  %s1085_s8 = sphi %s1121_s8, %s1682_s8   ;;  %s1081_s7 = sphi %s1119_s7, %s1681_s7   ;;  %s1077_s6 = sphi %s1117_s6, %s1680_s6  }
   0x7   : > { %s29_s14 = sadd.s32 1, %s1093_s10  ;;  %s38_s15 = sadd.s32 1, %s1085_s8 }
   0x8   : > { %p31_p0 = scmp.ge.s32.totalorder %s29_s14, 2  ;;  %p45_p1 = scmp.ne.s32.totalorder %s1085_s8, %s1081_s7 }
   0x9   : > { %p46_p2 = scmp.eq.s32.totalorder %s1097_s11, 0  ;;  %p51_p3 = scmp.ne.s32.totalorder %s1081_s7, %s1077_s6 }
   0xa   : > { %s1686_s14 = smov (%p31_p0, %s29_s14), 0  ;;  %p52_p5 = scmp.eq.s32.totalorder %s898_s12, 0 }
   0xb   : > { %p1158_p4 = por %p46_p2, %p45_p1  ;;  %s33_s17 = ssub.s32 %s1093_s10, %s1686_s14 }
   0xc   : > { %p77_p6 = scmp.eq.s32.totalorder %s898_s12, 1  ;;  %p36_p7 = scmp.eq.s32.totalorder %s33_s17, 0 }
   0xd   : > { %p1164_p8 = por %p52_p5, %p51_p3  ;;  %p83_p10 = scmp.eq.s32.totalorder %s899_s13, 1 }
   0xe   : > { %p1168_p9 = por %p77_p6, %p45_p1  ;;  %p901_p12 = scmp.ge.s32.totalorder %s1097_s11, 2 }
   0xf   : > { %s1173_s20 = scalar_select %p36_p7, %s1085_s8, %s38_s15  }
  0x10   : > { %p1175_p11 = por %p83_p10, %p51_p3  ;;  %p927_p13 = scmp.lt.s32.totalorder %s1097_s11, 2 }
  0x11   : > { %s103_s22 = sand.u32 1, %s1085_s8   ;;  %s913_s24 = sshll.u32 %s1093_s10, 6 }
  0x12   : > { %s902_s23 = sshll.u32 %s103_s22, 6  ;;  %s115_s27 = scalar_lea.hbm %s1674_s0, %s913_s24 }
  0x13   : > { %s107_s28 = scalar_lea.vmem [#allocation3], %s902_s23  ;;  %s116_s30 = sshll.u32 %s115_s27, 4  ;;  %s117_s30 = int_to_ptr.hbm [resolvable:$true] %s116_s30 }
  0x14   : > { %s118_s29 = sshll.u32 %s107_s28, 4  ;;  %p920_p0 = pnand %p927_p13, %p1158_p4  ;;  %s119_s29 = int_to_ptr.vmem [resolvable:$true] %s118_s29 }
  0x15   : > { %p905_p1 = scmp.ge.s32.totalorder %s1097_s11, 1  ;;  %s104_s2 = scalar_lea.sflag [#allocation4], %s103_s22 }
  0x16   : > { %s1099_s3 = smov 128   ;;  %s1100_s4 = smov 8  }
  0x17   : > { %922 = dma.hbm_to_vmem [thread:$0]  (!%p920_p0), %s117_s30, 1024, %s119_s29, %s104_s2, %s1099_s3, %s1099_s3, %s1100_s4  }
  0x18   : > { %p126_p2 = scmp.lt.s32.totalorder %s1097_s11, 3 }
  0x1a   : > { %p127_p3 = pnand %p905_p1, %p126_p2 }
  0x1b   : > { %s1191_s5 = sand.u32 (!%p127_p3), 1, %s1081_s7  }
  0x1c   : > { %130 = sbr.rel (%p127_p3) target bundleno = 395 (0x18b), region = 24  ;;  %s906_s12 = sshll.u32 (!%p127_p3), %s1191_s5, 6 }
  0x1d   : > { %s133_s13 = scalar_lea.sflag (!%p127_p3), [#allocation4], %s1191_s5  ;;  %s1197_s15 = scalar_lea.vmem (!%p127_p3), [#allocation3], %s906_s12 }
  0x21   : > { %1068 = dma.done.wait (%p1164_p8), %s133_s13, 1024  }
  0x22   : > { %1070 = vsyncadd (%p1164_p8), %s133_s13, 4294966272  ;;  %vm160_vm0 = vcmask 131072   ;;  %vm185_vm1 = vcmask 138368   ;;  %v1101_v0 = vmov 0.0   ;;  %vm202_vm2 = vcmask 130048   ;;  %v196_v1 = vld [vmem:[%s1197_s15 + $0x10] sm:$0xff] }
  0x23   : > { %163 = vst.msk [vmem:[#allocation2 + $0x4f] sm:$0x1] %vm160_vm0, %v1101_v0  ;;  %v194_v2 = vld [vmem:[%s1197_s15] sm:$0xff]  ;;  %v195_v8 = vld [vmem:[%s1197_s15 + $0x8] sm:$0xff]  ;;  %v200_v13 = vld [vmem:[%s1197_s15 + $0x30] sm:$0xff]  ;;  %s1102_s16 = smov 126  }
  0x24   : > { %188 = vst.msk [vmem:[#allocation2 + $0x58] sm:$0xff] %vm185_vm1, %v1101_v0  ;;  %v198_v9 = vld [vmem:[%s1197_s15 + $0x20] sm:$0xff]  ;;  %v199_v12 = vld [vmem:[%s1197_s15 + $0x28] sm:$0xff]  ;;  %v201_v15 = vld [vmem:[%s1197_s15 + $0x38] sm:$0xff]  ;;  %vm283_vm3 = vcmask 1045504   ;;  %vm428_vm4 = vcmask 1046528  }
  0x25   : > { %161 = vst.msk [vmem:[#allocation2 + $0xf] sm:$0x1] %vm160_vm0, %v1101_v0  ;;  %v197_v16 = vld [vmem:[%s1197_s15 + $0x18] sm:$0xff]  ;;  %s1103_s17 = smov 127   ;;  %vm158_vm5 = vcmask 1041400   ;;  %vm176_vm6 = vcmask 1048568  }
  0x26   : > { %165 = vst.msk [vmem:[#allocation2 + $0x8f] sm:$0x1] %vm160_vm0, %v1101_v0  ;;  %s1104_s18 = smov 1   ;;  %vm753_vm7 = vcmask 7168   ;;  %vm778_vm8 = vcmask 130055   ;;  %s1598_s22 = scalar_lea.vmem [#allocation6], %s906_s12 }
  0x27   : > { %167 = vst.msk [vmem:[#allocation2 + $0xcf] sm:$0x1] %vm160_vm0, %v1101_v0  ;;  %vm781_vm9 = vcmask 129024   ;;  %s914_s23 = sshll.u32 %s1089_s9, 6  ;;  %s808_s27 = sshll.u32 %s1598_s22, 4  ;;  %s809_s27 = int_to_ptr.vmem [resolvable:$true] %s808_s27 }
  0x28   : > { %169 = vst.msk [vmem:[#allocation2 + $0x38] sm:$0x1] %vm160_vm0, %v1101_v0  ;;  %s807_s26 = scalar_lea.hbm %s1675_s1, %s914_s23  ;;  %s793_s28 = scalar_lea.sflag [#allocation5], %s1191_s5 }
  0x29   : > { %171 = vst.msk [vmem:[#allocation2 + $0x78] sm:$0x1] %vm160_vm0, %v1101_v0  ;;  %s810_s9 = sshll.u32 %s807_s26, 4  ;;  %s1035_s4 = scalar_lea.hbm %s1675_s1, 128  ;;  %s811_s9 = int_to_ptr.hbm [resolvable:$true] %s810_s9 }
  0x2a   : > { %205 = vst.msk [vmem:[#allocation2 + $0x58] sm:$0xff] %vm202_vm2, %v196_v1  ;;  %v218_v3 = vld [vmem:[#allocation2 + $0x48] sm:$0x80]  ;;  %s1029_s29 = sshra.s32 %s811_s9, 4  ;;  %s1030_s29 = int_to_ptr.hbm [resolvable:$true] %s1029_s29 }
  0x2b   : > { %173 = vst.msk [vmem:[#allocation2 + $0xb8] sm:$0x1] %vm160_vm0, %v1101_v0  ;;  %s1031_s30 = scalar_lea.hbm %s1030_s29, 64  ;;  %p1036_p7 = scmp.lt.s32.totalorder %s1030_s29, %s1675_s1 }
  0x2c   : > { %175 = vst.msk [vmem:[#allocation2 + $0xf8] sm:$0x1] %vm160_vm0, %v1101_v0  ;;  %v212_v19 = vld [vmem:[#allocation2 + $0x8] sm:$0x80]  ;;  %p1032_p4 = scmp.ne.s32.totalorder %s1030_s29, %s1031_s30  ;;  %p1037_p8 = scmp.lt.s32.totalorder %s1035_s4, %s1031_s30 }
  0x2d   : > { %186 = vst.msk [vmem:[#allocation2 + $0x18] sm:$0xff] %vm185_vm1, %v1101_v0  ;;  %v224_v23 = vld [vmem:[#allocation2 + $0x88] sm:$0x80] }
  0x2e   : > { %187 = vst.msk [vmem:[#allocation2 + $0x28] sm:$0xff] %vm185_vm1, %v1101_v0  ;;  %v230_v57 = vld [vmem:[#allocation2 + $0xc8] sm:$0x80]  ;;  %p1033_p5 = pnand %p1032_p4, %p1168_p9  ;;  %p1038_p10 = por %p1037_p8, %p1036_p7 }
  0x2f   : > { %189 = vst.msk [vmem:[#allocation2 + $0x68] sm:$0xff] %vm185_vm1, %v1101_v0  ;;  %v240_v18 = vld [vmem:[#allocation2 + $0x38] sm:$0x1] }
  0x30   : > { %190 = vst.msk [vmem:[#allocation2 + $0x98] sm:$0xff] %vm185_vm1, %v1101_v0  ;;  %v292_v22 = vrot.slane %v240_v18, 2  ;;  %v246_v59 = vld [vmem:[#allocation2 + $0x78] sm:$0x1]  ;;  %p1034_p6 = pneg %p1033_p5 }
  0x31   : > { %v1224_v4 = vld [vmem:[#allocation2 + $0x58] sm:$0xff]  ;;  %191 = vst.msk [vmem:[#allocation2 + $0xa8] sm:$0xff] %vm185_vm1, %v1101_v0 }
  0x32   : > { %v1226_v5 = vld [vmem:[#allocation2 + $0x58] sm:$0xfe]  ;;  %v1232_v7 = vmul.f32 0.45186278, %v1224_v4  ;;  %192 = vst.msk [vmem:[#allocation2 + $0xd8] sm:$0xff] %vm185_vm1, %v1101_v0  ;;  %p1039_p13 = pnand %p1038_p10, %p1034_p6 }
  0x33   : > { %v295_v6 = vrot.slane %v1226_v5, 2  ;;  %193 = vst.msk [vmem:[#allocation2 + $0xe8] sm:$0xff] %vm185_vm1, %v1101_v0 }
  0x34   : > { %v436_v11 = vrot.slane %v1232_v7, 1  ;;  %203 = vst.msk [vmem:[#allocation2 + $0x18] sm:$0xff] %vm202_vm2, %v194_v2 }
  0x35   : > { %v355_v10 = vadd.f32 %v295_v6, %v218_v3  ;;  %204 = vst.msk [vmem:[#allocation2 + $0x28] sm:$0xff] %vm202_vm2, %v195_v8 }
  0x36   : > { %207 = vst.msk [vmem:[#allocation2 + $0x98] sm:$0xff] %vm202_vm2, %v198_v9 }
  0x37   : > { %v379_v14 = vmul.f32 0.27406862, %v355_v10  ;;  %208 = vst.msk [vmem:[#allocation2 + $0xa8] sm:$0xff] %vm202_vm2, %v199_v12  ;;  %v302_v10 = vrot.slane %v246_v59, 2 }
  0x38   : > { %209 = vst.msk [vmem:[#allocation2 + $0xd8] sm:$0xff] %vm202_vm2, %v200_v13 }
  0x39   : > { %v1253_v17 = vadd.f32 %v436_v11, %v379_v14  ;;  %210 = vst.msk [vmem:[#allocation2 + $0xe8] sm:$0xff] %vm202_vm2, %v201_v15 }
  0x3a   : > { %206 = vst.msk [vmem:[#allocation2 + $0x68] sm:$0xff] %vm202_vm2, %v197_v16 }
  0x3b   : > { %519 = vrot.lane.b32.xlu1 %v1253_v17, %s1102_s16  ;;  %v1260_v20 = vld [vmem:[#allocation2 + $0x18] sm:$0xff]  ;;  %179 = vst.msk [vmem:[#allocation2 + $0x50] sm:$0xff] %vm176_vm6, %v1101_v0 }
  0x3c   : > { %v1262_v21 = vld [vmem:[#allocation2 + $0x18] sm:$0xfe]  ;;  %v1266_v25 = vmul.f32 0.45186278, %v1260_v20  ;;  %v216_v26 = vld [vmem:[#allocation2 + $0x28] sm:$0x7f] }
  0x3d   : > { %v285_v24 = vrot.slane %v1262_v21, 2  ;;  %v1268_v27 = vld [vmem:[#allocation2 + $0x28] sm:$0xff]  ;;  %v226_v30 = vld [vmem:[#allocation2 + $0x98] sm:$0xff]  ;;  %162 = vst.msk [vmem:[#allocation2 + $0x47] sm:$0x1] %vm158_vm5, %v1101_v0 }
  0x3e   : > { %v288_v28 = vrot.slane %v1268_v27, 2  ;;  %v1272_v29 = vmul.f32 0.45186278, %v1268_v27  ;;  %v248_v31 = vld [vmem:[#allocation2 + $0x98] sm:$0xfe]  ;;  %v430_v33 = vrot.slane %v1266_v25, 1 }
  0x3f   : > { %v349_v32 = vadd.f32 %v285_v24, %v212_v19  ;;  %v305_v34 = vrot.slane %v248_v31, 2  ;;  %v1277_v35 = vld [vmem:[#allocation2 + $0xa8] sm:$0xff]  ;;  %v405_v37 = vmul.f32 0.45186278, %v226_v30  ;;  %v254_v46 = vld [vmem:[#allocation2 + $0xd8] sm:$0xfe] }
  0x40   : > { %v293_v36 = vsel %vm283_vm3, %v288_v28, %v292_v22  ;;  %v308_v38 = vrot.slane %v1277_v35, 2  ;;  %v1282_v39 = vmul.f32 0.45186278, %v1277_v35  ;;  %v433_v42 = vrot.slane %v1272_v29, 1  ;;  %v1285_v44 = vld [vmem:[#allocation2 + $0xe8] sm:$0xff]  ;;  %v232_v58 = vld [vmem:[#allocation2 + $0xd8] sm:$0xff] }
  0x41   : > { %v373_v40 = vmul.f32 0.27406862, %v349_v32  ;;  %v353_v41 = vadd.f32 %v293_v36, %v216_v26  ;;  %v361_v43 = vadd.f32 %v305_v34, %v224_v23  ;;  %v318_v51 = vrot.slane %v1285_v44, 2  ;;  %v244_v56 = vld [vmem:[#allocation2 + $0x68] sm:$0xff]  ;;  %v252_v22 = vld [vmem:[#allocation2 + $0xb8] sm:$0x1] }
  0x42   : > { %v309_v45 = vsel %vm283_vm3, %v305_v34, %v308_v38  ;;  %v445_v50 = vrot.slane %v1282_v39, 1  ;;  %v442_v54 = vrot.slane %v405_v37, 1  ;;  %v315_v55 = vrot.slane %v254_v46, 2  ;;  %v222_v14 = vld [vmem:[#allocation2 + $0x68] sm:$0x7f]  ;;  %177 = vst.msk [vmem:[#allocation2 + $0x10] sm:$0xff] %vm176_vm6, %v1101_v0 }
  0x43   : > { %v1290_v47 = vadd.f32 %v430_v33, %v373_v40  ;;  %v377_v48 = vmul.f32 0.27406862, %v353_v41  ;;  %v363_v49 = vadd.f32 %v309_v45, %v226_v30  ;;  %v385_v53 = vmul.f32 0.27406862, %v361_v43  ;;  %v228_v21 = vld [vmem:[#allocation2 + $0xa8] sm:$0x7f] }
  0x44   : > { %v446_v61 = vsel %vm428_vm4, %v442_v54, %v445_v50  ;;  %v319_v62 = vsel %vm283_vm3, %v315_v55, %v318_v51  ;;  %v411_v63 = vmul.f32 0.45186278, %v1285_v44  ;;  %v298_v1 = vrot.slane %v244_v56, 2  ;;  %v258_v37 = vld [vmem:[#allocation2 + $0xf8] sm:$0x1]  ;;  %178 = vst.msk [vmem:[#allocation2 + $0x20] sm:$0xff] %vm176_vm6, %v1101_v0 }
  0x45   : > { %513 = vrot.lane.b32.xlu0 %v1290_v47, %s1102_s16  ;;  %v1298_v52 = vadd.f32 %v433_v42, %v377_v48  ;;  %v387_v60 = vmul.f32 0.27406862, %v363_v49  ;;  %v403_v2 = vmul.f32 0.45186278, %v244_v56  ;;  %v1307_v3 = vadd.f32 %v442_v54, %v385_v53  ;;  %v234_v46 = vld [vmem:[#allocation2 + $0xe8] sm:$0x7f] }
  0x46   : > { %v367_v8 = vadd.f32 %v315_v55, %v230_v57  ;;  %v409_v9 = vmul.f32 0.45186278, %v232_v58  ;;  %v299_v12 = vsel %vm283_vm3, %v295_v6, %v298_v1  ;;  %v369_v16 = vadd.f32 %v319_v62, %v232_v58  ;;  %159 = vst.msk [vmem:[#allocation2 + $0x7] sm:$0x1] %vm158_vm5, %v1101_v0 }
  0x47   : > { %517 = vrot.lane.b32.xlu1 %v1298_v52, %s1102_s16  ;;  %v439_v13 = vrot.slane %v403_v2, 1  ;;  %v1312_v15 = vadd.f32 %v446_v61, %v387_v60  ;;  %v357_v18 = vadd.f32 %v299_v12, %v1224_v4  ;;  %v303_v19 = vsel %vm283_vm3, %v298_v1, %v302_v10  ;;  %164 = vst.msk [vmem:[#allocation2 + $0x87] sm:$0x1] %vm158_vm5, %v1101_v0 }
  0x48   : > { %v451_v23 = vrot.slane %v411_v63, 1  ;;  %v391_v5 = vmul.f32 0.27406862, %v367_v8  ;;  %v448_v6 = vrot.slane %v409_v9, 1  ;;  %v359_v30 = vadd.f32 %v303_v19, %v222_v14  ;;  %166 = vst.msk [vmem:[#allocation2 + $0xc7] sm:$0x1] %vm158_vm5, %v1101_v0 }
  0x49   : > { %v440_v26 = vsel %vm428_vm4, %v436_v11, %v439_v13  ;;  %v381_v27 = vmul.f32 0.27406862, %v357_v18  ;;  %v289_v31 = vsel %vm283_vm3, %v285_v24, %v288_v28  ;;  %v312_v4 = vrot.slane %v252_v22, 2  ;;  %168 = vst.msk [vmem:[#allocation2 + $0x30] sm:$0x1] %vm158_vm5, %v1101_v0 }
  0x4a   : > { %v393_v32 = vmul.f32 0.27406862, %v369_v16  ;;  %v452_v7 = vsel %vm428_vm4, %v448_v6, %v451_v23  ;;  %v1329_v11 = vadd.f32 %v448_v6, %v391_v5  ;;  %v351_v35 = vadd.f32 %v289_v31, %v1260_v20  ;;  %170 = vst.msk [vmem:[#allocation2 + $0x70] sm:$0x1] %vm158_vm5, %v1101_v0  ;;  %v235_v8 = vld [vmem:[#allocation2 + $0x10] sm:$0xfe] }
  0x4b   : > { %v1326_v34 = vadd.f32 %v440_v26, %v381_v27  ;;  %v383_v36 = vmul.f32 0.27406862, %v359_v30  ;;  %v313_v24 = vsel %vm283_vm3, %v308_v38, %v312_v4  ;;  %v434_v20 = vsel %vm428_vm4, %v430_v33, %v433_v42  ;;  %172 = vst.msk [vmem:[#allocation2 + $0xb0] sm:$0x1] %vm158_vm5, %v1101_v0  ;;  %v1427_v2 = vld [vmem:[#allocation2 + $0x20] sm:$0xff] }
  0x4c   : > { %v1335_v28 = vadd.f32 %v452_v7, %v393_v32  ;;  %v375_v40 = vmul.f32 0.27406862, %v351_v35  ;;  %v365_v43 = vadd.f32 %v313_v24, %v228_v21  ;;  %v322_v44 = vrot.slane %v258_v37, 2  ;;  %174 = vst.msk [vmem:[#allocation2 + $0xf0] sm:$0x1] %vm158_vm5, %v1101_v0  ;;  %v219_v21 = vld [vmem:[#allocation2 + $0x50] sm:$0xff] }
  0x4d   : > { %525 = vrot.lane.b32.xlu0 %v1307_v3, %s1102_s16  ;;  %521 = vrot.lane.b32.xlu2 %v1326_v34, %s1102_s16  ;;  %v1339_v41 = vadd.f32 %v439_v13, %v383_v36  ;;  %v597_v33 = vmul.f32 0.45186278, %v1290_v47  ;;  %v600_v39 = vmul.f32 0.45186278, %v1253_v17  ;;  %v599_v54 = vmul.f32 0.45186278, %v1298_v52 }
  0x4e   : > { %v1348_v38 = vadd.f32 %v434_v20, %v375_v40  ;;  %v389_v45 = vmul.f32 0.27406862, %v365_v43  ;;  %v323_v48 = vsel %vm283_vm3, %v318_v51, %v322_v44  ;;  %v601_v51 = vmul.f32 0.45186278, %v1326_v34  ;;  %180 = vst.msk [vmem:[#allocation2 + $0x60] sm:$0xff] %vm176_vm6, %v1101_v0  ;;  %v213_v13 = vld [vmem:[#allocation2 + $0x10] sm:$0xff] }
  0x4f   : > { %527 = vrot.lane.b32.xlu1 %v1312_v15, %s1102_s16  ;;  %v371_v29 = vadd.f32 %v323_v48, %v234_v46  ;;  %v603_v55 = vmul.f32 0.45186278, %v1307_v3  ;;  %v607_v56 = vmul.f32 0.45186278, %v1335_v28  ;;  %v602_v57 = vmul.f32 0.45186278, %v1339_v41 }
  0x50   : > { %v598_v49 = vmul.f32 0.45186278, %v1348_v38  ;;  %v1358_v25 = vadd.f32 %v445_v50, %v389_v45  ;;  %v604_v50 = vmul.f32 0.45186278, %v1312_v15  ;;  %181 = vst.msk [vmem:[#allocation2 + $0x90] sm:$0xff] %vm176_vm6, %v1101_v0  ;;  %v286_v9 = vrot.slane %v1427_v2, 2 }
  0x51   : > { %v395_v42 = vmul.f32 0.27406862, %v371_v29  ;;  %182 = vst.msk [vmem:[#allocation2 + $0xa0] sm:$0xff] %vm176_vm6, %v1101_v0  ;;  %v606_v58 = vmul.f32 0.45186278, %v1329_v11  ;;  %v284_v10 = vrot.slane %v235_v8, 2 }
  0x52   : > { %183 = vst.msk [vmem:[#allocation2 + $0xd0] sm:$0xff] %vm176_vm6, %v1101_v0  ;;  %v605_v59 = vmul.f32 0.45186278, %v1358_v25  ;;  %v1435_v14 = vmul.f32 0.45186278, %v1427_v2 }
  0x53   : > { %v1366_v53 = vadd.f32 %v451_v23, %v395_v42  ;;  %184 = vst.msk [vmem:[#allocation2 + $0xe0] sm:$0xff] %vm176_vm6, %v1101_v0  ;;  %v287_v18 = vsel %vm283_vm3, %v284_v10, %v286_v9  ;;  %v396_v19 = vmul.f32 0.45186278, %v213_v13  ;;  %v211_v22 = vld [vmem:[#allocation2] sm:$0x80] }
  0x54   : > { %v350_v23 = vadd.f32 %v287_v18, %v213_v13  ;;  %v431_v26 = vrot.slane %v1435_v14, 1  ;;  %v241_v6 = vld [vmem:[#allocation2 + $0x50] sm:$0xfe]  ;;  %v348_v27 = vadd.f32 %v284_v10, %v211_v22  ;;  %v217_v24 = vld [vmem:[#allocation2 + $0x40] sm:$0x80] }
  0x55   : > { %531 = vrot.lane.b32.xlu0 %v1329_v11, %s1102_s16  ;;  %523 = vrot.lane.b32.xlu2 %v1339_v41, %s1102_s16  ;;  %v608_v60 = vmul.f32 0.45186278, %v1366_v53  ;;  %v429_v30 = vrot.slane %v396_v19, 1  ;;  %v1447_v4 = vld [vmem:[#allocation2 + $0x60] sm:$0xff]  ;;  %v294_v7 = vrot.slane %v241_v6, 2 }
  0x56   : > { %v374_v32 = vmul.f32 0.27406862, %v350_v23  ;;  %v372_v37 = vmul.f32 0.27406862, %v348_v27  ;;  %v296_v40 = vrot.slane %v1447_v4, 2 }
  0x57   : > { %533 = vrot.lane.b32.xlu1 %v1335_v28, %s1102_s16  ;;  %v432_v36 = vsel %vm428_vm4, %v429_v30, %v431_v26  ;;  %v400_v20 = vmul.f32 0.45186278, %v219_v21  ;;  %v354_v44 = vadd.f32 %v294_v7, %v217_v24  ;;  %v247_v46 = vld [vmem:[#allocation2 + $0x90] sm:$0xfe] }
  0x58   : > { %v479_v43 = vadd.f32 %v432_v36, %v374_v32  ;;  %v477_v45 = vadd.f32 %v429_v30, %v372_v37  ;;  %v297_v48 = vsel %vm283_vm3, %v294_v7, %v296_v40  ;;  %v1481_v30 = vld [vmem:[#allocation2 + $0xa0] sm:$0xff] }
  0x59   : > { %v1475_v22 = vld [vmem:[#allocation2 + $0xd0] sm:$0xfe]  ;;  %v227_v14 = vld [vmem:[#allocation2 + $0xa0] sm:$0x7f] }
  0x5d   : > { %515 = vrot.lane.b32.xlu0 %v1348_v38, %s1102_s16  ;;  %529 = vrot.lane.b32.xlu2 %v1358_v25, %s1102_s16 }
  0x5f   : > { %623 = vrot.lane.b32.xlu1 %v598_v49, %s1103_s17  ;;  %v1459_v49 = vmul.f32 0.45186278, %v1447_v4 }
  0x61   : > { %v437_v8 = vrot.slane %v1459_v49, 1 }
  0x65   : > { %621 = vrot.lane.b32.xlu0 %v597_v33, %s1103_s17  ;;  %535 = vrot.lane.b32.xlu2 %v1366_v53, %s1102_s16 }
  0x67   : > { %629 = vrot.lane.b32.xlu1 %v601_v51, %s1103_s17  ;;  %v435_v51 = vrot.slane %v400_v20, 1 }
  0x6d   : > { %627 = vrot.lane.b32.xlu0 %v600_v39, %s1103_s17  ;;  %625 = vrot.lane.b32.xlu2 %v599_v54, %s1103_s17  ;;  %v378_v39 = vmul.f32 0.27406862, %v354_v44 }
  0x6f   : > { %635 = vrot.lane.b32.xlu1 %v604_v50, %s1103_s17  ;;  %v304_v50 = vrot.slane %v247_v46, 2  ;;  %v483_v23 = vadd.f32 %v435_v51, %v378_v39 }
  0x75   : > { %633 = vrot.lane.b32.xlu0 %v603_v55, %s1103_s17  ;;  %631 = vrot.lane.b32.xlu2 %v602_v57, %s1103_s17  ;;  %v356_v57 = vadd.f32 %v297_v48, %v219_v21  ;;  %v239_v21 = vld [vmem:[#allocation2 + $0x30] sm:$0x1]  ;;  %v306_v48 = vrot.slane %v1481_v30, 2 }
  0x76   : > { %v290_v39 = vrot.slane %v239_v21, 2 }
  0x77   : > { %641 = vrot.lane.b32.xlu1 %v607_v56, %s1103_s17 }
  0x7d   : > { %639 = vrot.lane.b32.xlu0 %v606_v58, %s1103_s17  ;;  %637 = vrot.lane.b32.xlu2 %v605_v59, %s1103_s17  ;;  %v223_v58 = vld [vmem:[#allocation2 + $0x80] sm:$0x80]  ;;  %v225_v59 = vld [vmem:[#allocation2 + $0x90] sm:$0xff] }
  0x7e   : > { %v360_v18 = vadd.f32 %v304_v50, %v223_v58  ;;  %v1473_v19 = vmul.f32 0.45186278, %v225_v59 }
  0x80   : > { %v384_v24 = vmul.f32 0.27406862, %v360_v18  ;;  %v441_v37 = vrot.slane %v1473_v19, 1  ;;  %v215_v19 = vld [vmem:[#allocation2 + $0x20] sm:$0x7f] }
  0x85   : > { %643 = vrot.lane.b32.xlu2 %v608_v60, %s1103_s17 }
  0xa7   : > { %v1423_v62 = vpop.permute.xlu2 %521 }
  0xad   : > { %v1421_v61 = vpop.permute.xlu1 %519 }
  0xae   : > { %v555_v44 = vadd.f32 %v1421_v61, %v483_v23  ;;  %v291_v23 = vsel %vm283_vm3, %v286_v9, %v290_v39 }
  0xaf   : > { %v1429_v0 = vpop.permute.xlu2 %523  ;;  %v352_v2 = vadd.f32 %v291_v23, %v215_v19 }
  0xb7   : > { %v514_v63 = vpop.permute.xlu0 %513  ;;  %v1443_v5 = vpop.permute.xlu2 %529 }
  0xb8   : > { %v549_v55 = vadd.f32 %v514_v63, %v477_v45  ;;  %v550_v56 = vadd.f32 %v514_v63, %v1290_v47  ;;  %v380_v47 = vmul.f32 0.27406862, %v356_v57  ;;  %v438_v63 = vsel %vm428_vm4, %v435_v51, %v437_v8  ;;  %v1491_v51 = vld [vmem:[#allocation2 + $0xd0] sm:$0xff] }
  0xb9   : > { %v1425_v1 = vpop.permute.xlu1 %517  ;;  %v556_v45 = vadd.f32 %v1421_v61, %v1253_v17  ;;  %v1499_v58 = vmul.f32 0.45186278, %v1491_v51  ;;  %v579_v17 = vmul.f32 0.27406862, %v555_v44 }
  0xba   : > { %v554_v10 = vadd.f32 %v1425_v1, %v1298_v52  ;;  %v573_v6 = vmul.f32 0.27406862, %v549_v55  ;;  %v574_v27 = vmul.f32 0.27406862, %v550_v56  ;;  %v485_v46 = vadd.f32 %v438_v63, %v380_v47  ;;  %v245_v47 = vld [vmem:[#allocation2 + $0x70] sm:$0x1] }
  0xbb   : > { %v489_v56 = vadd.f32 %v441_v37, %v384_v24  ;;  %v580_v61 = vmul.f32 0.27406862, %v556_v45  ;;  %v447_v21 = vrot.slane %v1499_v58, 1  ;;  %v300_v24 = vrot.slane %v245_v47, 2 }
  0xbc   : > { %v578_v32 = vmul.f32 0.27406862, %v554_v10  ;;  %v307_v10 = vsel %vm283_vm3, %v304_v50, %v306_v48 }
  0xbd   : > { %v362_v63 = vadd.f32 %v307_v10, %v225_v59  ;;  %v560_v59 = vadd.f32 %v1429_v0, %v1339_v41  ;;  %v301_v41 = vsel %vm283_vm3, %v296_v40, %v300_v24  ;;  %v251_v10 = vld [vmem:[#allocation2 + $0xb0] sm:$0x1] }
  0xbf   : > { %v1432_v12 = vpop.permute.xlu0 %525  ;;  %v1463_v33 = vpop.permute.xlu2 %535 }
  0xc0   : > { %v561_v50 = vadd.f32 %v1432_v12, %v489_v56  ;;  %v221_v56 = vld [vmem:[#allocation2 + $0x60] sm:$0x7f] }
  0xc1   : > { %v1437_v16 = vpop.permute.xlu1 %527  ;;  %v358_v4 = vadd.f32 %v301_v41, %v221_v56 }
  0xc2   : > { %v585_v45 = vmul.f32 0.27406862, %v561_v50 }
  0xc3   : > { %v382_v50 = vmul.f32 0.27406862, %v358_v4  ;;  %v564_v4 = vadd.f32 %v1437_v16, %v1312_v15 }
  0xc7   : > { %v1445_v31 = vpop.permute.xlu0 %531  ;;  %v1485_v20 = vpop.permute.xlu2 %625 }
  0xc8   : > { %v662_v55 = vadd.f32 %v1485_v20, %v578_v32 }
  0xc9   : > { %v1449_v35 = vpop.permute.xlu1 %533 }
  0xcf   : > { %v1461_v29 = vpop.permute.xlu0 %515 }
  0xd0   : > { %v551_v42 = vadd.f32 %v1461_v29, %v479_v43  ;;  %v314_v43 = vrot.slane %v1475_v22, 2  ;;  %v552_v22 = vadd.f32 %v1461_v29, %v1348_v38 }
  0xd1   : > { %v1466_v54 = vpop.permute.xlu1 %623 }
  0xd2   : > { %v575_v60 = vmul.f32 0.27406862, %v551_v42  ;;  %v229_v42 = vld [vmem:[#allocation2 + $0xc0] sm:$0x80] }
  0xd3   : > { %v366_v57 = vadd.f32 %v314_v43, %v229_v42  ;;  %v386_v42 = vmul.f32 0.27406862, %v362_v63 }
  0xd4   : > { %v659_v13 = vadd.f32 %v1466_v54, %v575_v60  ;;  %v557_v60 = vadd.f32 %v1423_v62, %v485_v46 }
  0xd6   : > { %709 = vrot.lane.b32.xlu2 %v659_v13, %s1104_s18  ;;  %v1507_v13 = vmul.f32 0.45186278, %v1481_v30  ;;  %v487_v30 = vadd.f32 %v437_v8, %v382_v50 }
  0xd7   : > { %v622_v52 = vpop.permute.xlu0 %621 }
  0xd8   : > { %v657_v7 = vadd.f32 %v622_v52, %v573_v6  ;;  %v658_v36 = vadd.f32 %v622_v52, %v574_v27  ;;  %v390_v52 = vmul.f32 0.27406862, %v366_v57  ;;  %v443_v9 = vrot.slane %v1507_v13, 1 }
  0xd9   : > { %v1512_v32 = vpop.permute.xlu1 %629  ;;  %v584_v57 = vmul.f32 0.27406862, %v560_v59  ;;  %v559_v56 = vadd.f32 %v1429_v0, %v487_v30 }
  0xda   : > { %707 = vrot.lane.b32.xlu1 %v658_v36, %s1104_s18  ;;  %705 = vrot.lane.b32.xlu0 %v657_v7, %s1104_s18  ;;  %v581_v7 = vmul.f32 0.27406862, %v557_v60  ;;  %v562_v36 = vadd.f32 %v1432_v12, %v1307_v3  ;;  %v495_v3 = vadd.f32 %v447_v21, %v390_v52  ;;  %v376_v12 = vmul.f32 0.27406862, %v352_v2 }
  0xdb   : > { %v444_v39 = vsel %vm428_vm4, %v441_v37, %v443_v9  ;;  %v583_v58 = vmul.f32 0.27406862, %v559_v56 }
  0xdc   : > { %v665_v44 = vadd.f32 %v1512_v32, %v581_v7  ;;  %v586_v46 = vmul.f32 0.27406862, %v562_v36  ;;  %v491_v19 = vadd.f32 %v444_v39, %v386_v42  ;;  %v567_v23 = vadd.f32 %v1445_v31, %v495_v3  ;;  %v257_v42 = vld [vmem:[#allocation2 + $0xf0] sm:$0x1] }
  0xdd   : > { %v481_v40 = vadd.f32 %v431_v26, %v376_v12  ;;  %v320_v39 = vrot.slane %v257_v42, 2 }
  0xde   : > { %715 = vrot.lane.b32.xlu2 %v662_v55, %s1104_s18  ;;  %v563_v63 = vadd.f32 %v1437_v16, %v491_v19  ;;  %v591_v52 = vmul.f32 0.27406862, %v567_v23  ;;  %v570_v16 = vadd.f32 %v1449_v35, %v1335_v28 }
  0xdf   : > { %v628_v18 = vpop.permute.xlu0 %627  ;;  %v553_v2 = vadd.f32 %v1425_v1, %v481_v40  ;;  %v572_v40 = vadd.f32 %v1463_v33, %v1366_v53 }
  0xe0   : > { %v663_v6 = vadd.f32 %v628_v18, %v579_v17  ;;  %v664_v27 = vadd.f32 %v628_v18, %v580_v61  ;;  %v255_v17 = vld [vmem:[#allocation2 + $0xe0] sm:$0xff]  ;;  %v1533_v18 = vpop.permute.xlu2 %631 }
  0xe1   : > { %v316_v37 = vrot.slane %v255_v17, 2  ;;  %v668_v47 = vadd.f32 %v1533_v18, %v584_v57  ;;  %v577_v3 = vmul.f32 0.27406862, %v553_v2  ;;  %v233_v57 = vld [vmem:[#allocation2 + $0xe0] sm:$0x7f] }
  0xe2   : > { %719 = vrot.lane.b32.xlu1 %v664_v27, %s1104_s18  ;;  %717 = vrot.lane.b32.xlu0 %v663_v6, %s1104_s18  ;;  %v568_v6 = vadd.f32 %v1445_v31, %v1329_v11  ;;  %v310_v27 = vrot.slane %v251_v10, 2  ;;  %v410_v31 = vmul.f32 0.45186278, %v255_v17 }
  0xe3   : > { %v317_v11 = vsel %vm283_vm3, %v314_v43, %v316_v37  ;;  %v661_v8 = vadd.f32 %v1485_v20, %v577_v3 }
  0xe4   : > { %v592_v7 = vmul.f32 0.27406862, %v568_v6  ;;  %v311_v26 = vsel %vm283_vm3, %v306_v48, %v310_v27  ;;  %v449_v43 = vrot.slane %v410_v31, 1  ;;  %v566_v48 = vadd.f32 %v1443_v5, %v1358_v25 }
  0xe5   : > { %v364_v1 = vadd.f32 %v311_v26, %v227_v14  ;;  %v321_v25 = vsel %vm283_vm3, %v316_v37, %v320_v39  ;;  %v588_v27 = vmul.f32 0.27406862, %v564_v4 }
  0xe6   : > { %721 = vrot.lane.b32.xlu2 %v665_v44, %s1104_s18  ;;  %v636_v44 = vpop.permute.xlu1 %635  ;;  %v450_v29 = vsel %vm428_vm4, %v447_v21, %v449_v43  ;;  %v590_v41 = vmul.f32 0.27406862, %v566_v48  ;;  %v370_v21 = vadd.f32 %v321_v25, %v233_v57 }
  0xe7   : > { %v634_v55 = vpop.permute.xlu0 %633  ;;  %v388_v38 = vmul.f32 0.27406862, %v364_v1 }
  0xe8   : > { %v669_v61 = vadd.f32 %v634_v55, %v585_v45  ;;  %v670_v60 = vadd.f32 %v634_v55, %v586_v46  ;;  %v587_v45 = vmul.f32 0.27406862, %v563_v63  ;;  %v368_v46 = vadd.f32 %v317_v11, %v1491_v51  ;;  %v638_v17 = vpop.permute.xlu2 %637 }
  0xe9   : > { %v576_v55 = vmul.f32 0.27406862, %v552_v22  ;;  %v493_v0 = vadd.f32 %v443_v9, %v388_v38  ;;  %v394_v23 = vmul.f32 0.27406862, %v370_v21 }
  0xea   : > { %731 = vrot.lane.b32.xlu1 %v670_v60, %s1104_s18  ;;  %729 = vrot.lane.b32.xlu0 %v669_v61, %s1104_s18  ;;  %v671_v12 = vadd.f32 %v636_v44, %v587_v45  ;;  %v392_v51 = vmul.f32 0.27406862, %v368_v46  ;;  %v558_v61 = vadd.f32 %v1423_v62, %v1326_v34  ;;  %v667_v62 = vadd.f32 %v1533_v18, %v583_v58 }
  0xeb   : > { %v660_v49 = vadd.f32 %v1466_v54, %v576_v55  ;;  %v674_v54 = vadd.f32 %v638_v17, %v590_v41  ;;  %v565_v19 = vadd.f32 %v1443_v5, %v493_v0  ;;  %v499_v37 = vadd.f32 %v449_v43, %v394_v23 }
  0xec   : > { %v497_v60 = vadd.f32 %v450_v29, %v392_v51  ;;  %v582_v10 = vmul.f32 0.27406862, %v558_v61  ;;  %v596_v18 = vmul.f32 0.27406862, %v572_v40 }
  0xed   : > { %v589_v9 = vmul.f32 0.27406862, %v565_v19 }
  0xee   : > { %727 = vrot.lane.b32.xlu2 %v668_v47, %s1104_s18  ;;  %v569_v20 = vadd.f32 %v1449_v35, %v497_v60  ;;  %v666_v34 = vadd.f32 %v1512_v32, %v582_v10  ;;  %v642_v6 = vpop.permute.xlu1 %641  ;;  %v571_v32 = vadd.f32 %v1463_v33, %v499_v37  ;;  %v672_v47 = vadd.f32 %v636_v44, %v588_v27 }
  0xef   : > { %v640_v36 = vpop.permute.xlu0 %639  ;;  %v673_v63 = vadd.f32 %v638_v17, %v589_v9 }
  0xf0   : > { %v675_v24 = vadd.f32 %v640_v36, %v591_v52  ;;  %v676_v59 = vadd.f32 %v640_v36, %v592_v7  ;;  %v593_v13 = vmul.f32 0.27406862, %v569_v20  ;;  %v644_v15 = vpop.permute.xlu2 %643  ;;  %v595_v52 = vmul.f32 0.27406862, %v571_v32 }
  0xf1   : > { %v680_v53 = vadd.f32 %v644_v15, %v596_v18  ;;  %v594_v7 = vmul.f32 0.27406862, %v570_v16 }
  0xf2   : > { %743 = vrot.lane.b32.xlu1 %v676_v59, %s1104_s18  ;;  %741 = vrot.lane.b32.xlu0 %v675_v24, %s1104_s18  ;;  %v677_v5 = vadd.f32 %v642_v6, %v593_v13  ;;  %v679_v11 = vadd.f32 %v644_v15, %v595_v52 }
  0xf3   : > { %v678_v50 = vadd.f32 %v642_v6, %v594_v7 }
  0xf6   : > { %733 = vrot.lane.b32.xlu2 %v671_v12, %s1104_s18 }
  0xfa   : > { %713 = vrot.lane.b32.xlu1 %v661_v8, %s1104_s18  ;;  %711 = vrot.lane.b32.xlu0 %v660_v49, %s1104_s18 }
  0xfe   : > { %739 = vrot.lane.b32.xlu2 %v674_v54, %s1104_s18 }
 0x102   : > { %725 = vrot.lane.b32.xlu1 %v667_v62, %s1104_s18  ;;  %723 = vrot.lane.b32.xlu0 %v666_v34, %s1104_s18 }
 0x106   : > { %745 = vrot.lane.b32.xlu2 %v677_v5, %s1104_s18 }
 0x10a   : > { %737 = vrot.lane.b32.xlu1 %v673_v63, %s1104_s18  ;;  %735 = vrot.lane.b32.xlu0 %v672_v47, %s1104_s18 }
 0x10e   : > { %751 = vrot.lane.b32.xlu2 %v680_v53, %s1104_s18 }
 0x112   : > { %749 = vrot.lane.b32.xlu1 %v679_v11, %s1104_s18  ;;  %747 = vrot.lane.b32.xlu0 %v678_v50, %s1104_s18 }
 0x130   : > { %v710_v33 = vpop.permute.xlu2 %709 }
 0x138   : > { %v716_v31 = vpop.permute.xlu2 %715 }
 0x140   : > { %v722_v2 = vpop.permute.xlu2 %721 }
 0x148   : > { %v728_v59 = vpop.permute.xlu2 %727 }
 0x14c   : > { %v708_v28 = vpop.permute.xlu1 %707  ;;  %v706_v35 = vpop.permute.xlu0 %705 }
 0x14d   : > { %v754_v36 = vsel %vm753_vm7, %v706_v35, %v708_v28 }
 0x14e   : > { %779 = vst.msk [vmem:[%s1598_s22 - $0x7] sm:$0x80] %vm778_vm8, %v754_v36 }
 0x150   : > { %v734_v1 = vpop.permute.xlu2 %733 }
 0x154   : > { %v720_v14 = vpop.permute.xlu1 %719  ;;  %v718_v26 = vpop.permute.xlu0 %717 }
 0x155   : > { %v757_v24 = vsel %vm753_vm7, %v718_v26, %v720_v14 }
 0x156   : > { %783 = vst.msk [vmem:[%s1598_s22 + $0x9] sm:$0x80] %vm778_vm8, %v757_v24 }
 0x158   : > { %v740_v39 = vpop.permute.xlu2 %739 }
 0x15c   : > { %v732_v44 = vpop.permute.xlu1 %731  ;;  %v730_v45 = vpop.permute.xlu0 %729 }
 0x15d   : > { %v760_v46 = vsel %vm753_vm7, %v730_v45, %v732_v44 }
 0x15e   : > { %786 = vst.msk [vmem:[%s1598_s22 + $0x19] sm:$0x80] %vm778_vm8, %v760_v46 }
 0x160   : > { %v746_v56 = vpop.permute.xlu2 %745 }
 0x164   : > { %v744_v22 = vpop.permute.xlu1 %743  ;;  %v742_v42 = vpop.permute.xlu0 %741 }
 0x165   : > { %v763_v43 = vsel %vm753_vm7, %v742_v42, %v744_v22 }
 0x166   : > { %789 = vst.msk [vmem:[%s1598_s22 + $0x29] sm:$0x80] %vm778_vm8, %v763_v43 }
 0x168   : > { %v752_v25 = vpop.permute.xlu2 %751 }
 0x16c   : > { %v714_v3 = vpop.permute.xlu1 %713  ;;  %v712_v30 = vpop.permute.xlu0 %711 }
 0x16d   : > { %v756_v48 = vsel %vm753_vm7, %v714_v3, %v716_v31  ;;  %v755_v12 = vsel %vm753_vm7, %v710_v33, %v712_v30 }
 0x16e   : > { %782 = vst.msk [vmem:[%s1598_s22 + $0x9] sm:$0x7f] %vm781_vm9, %v756_v48 }
 0x16f   : > { %780 = vst.msk [vmem:[%s1598_s22 + $0x1] sm:$0xff] %vm202_vm2, %v755_v12 }
 0x174   : > { %v726_v51 = vpop.permute.xlu1 %725  ;;  %v724_v55 = vpop.permute.xlu0 %723 }
 0x175   : > { %v759_v38 = vsel %vm753_vm7, %v726_v51, %v728_v59  ;;  %v758_v29 = vsel %vm753_vm7, %v722_v2, %v724_v55 }
 0x176   : > { %785 = vst.msk [vmem:[%s1598_s22 + $0x19] sm:$0x7f] %vm781_vm9, %v759_v38 }
 0x177   : > { %784 = vst.msk [vmem:[%s1598_s22 + $0x11] sm:$0xff] %vm202_vm2, %v758_v29 }
 0x17c   : > { %v738_v41 = vpop.permute.xlu1 %737  ;;  %v736_v49 = vpop.permute.xlu0 %735 }
 0x17d   : > { %v762_v8 = vsel %vm753_vm7, %v738_v41, %v740_v39  ;;  %v761_v57 = vsel %vm753_vm7, %v734_v1, %v736_v49 }
 0x17e   : > { %788 = vst.msk [vmem:[%s1598_s22 + $0x29] sm:$0x7f] %vm781_vm9, %v762_v8 }
 0x17f   : > { %787 = vst.msk [vmem:[%s1598_s22 + $0x21] sm:$0xff] %vm202_vm2, %v761_v57 }
 0x184   : > { %v750_v17 = vpop.permute.xlu1 %749  ;;  %v748_v61 = vpop.permute.xlu0 %747 }
 0x185   : > { %v765_v60 = vsel %vm753_vm7, %v750_v17, %v752_v25  ;;  %v764_v58 = vsel %vm753_vm7, %v746_v56, %v748_v61 }
 0x186   : > { %791 = vst.msk [vmem:[%s1598_s22 + $0x39] sm:$0x7f] %vm781_vm9, %v765_v60 }
 0x187   : > { %790 = vst.msk [vmem:[%s1598_s22 + $0x31] sm:$0xff] %vm202_vm2, %v764_v58 }
 0x188   : > { %1042 = shalt.err (!%p1039_p13)
}
 0x189   : > { %s1105_s5 = smov 128   ;;  %s1106_s15 = smov 8  }
 0x18a   : > { %917 = dma.vmem_to_hbm [thread:$0]  (%p1168_p9), %s809_s27, 1024, %s811_s9, %s793_s28, %s1105_s5, %s1105_s5, %s1106_s15  }
 0x18b PF: > { %s825_s16 = sand.u32 1, %s1077_s6   ;;  %p924_p0 = pnand %p901_p12, %p1175_p11 }
 0x18c   : > { %s826_s17 = scalar_lea.sflag [#allocation5], %s825_s16 }
 0x18d   : > { %p925_p1 = pneg %p924_p0 }
 0x18f   : > { %1072 = dma.done.wait (%p925_p1), %s826_s17, 1024  }
 0x190   : > { %1074 = vsyncadd (%p925_p1), %s826_s17, 4294966272  ;;  %s17_s11 = sadd.s32 1, %s1097_s11   ;;  %s1680_s6 = smov %s1081_s7 }
 0x191   : > { %p14_p2 = scmp.ge.s32.totalorder %s17_s11, 4   ;;  %s1681_s7 = smov %s1085_s8 }
 0x192   : > { %s1682_s8 = smov %s1173_s20  ;;  %s1683_s9 = smov %s1093_s10 }
 0x193   : > { %s1684_s10 = smov %s1686_s14  ;;  %16 = sbr.rel (!%p14_p2) target bundleno = 6 (0x6), region = 69 }
 0x198   :  { %832 = vsyncpa [#allocation4], 1 }
 0x199   :  { %834 = vsyncpa [#allocation4 + $0x1], 1 }
 0x19a   :  { %835 = vsyncpa [#allocation5], 1 }
 0x19b   :  { %837 = vsyncpa [#allocation5 + $0x1], 1 }

</bundles_post_ra>
